<compile_context>
chip_gen: v6e
topology: v6e:2x2x1
jax: 0.10.0
libtpu: 0.0.40
codegen_flags: <defaults>
</compile_context>

<pallas_src>
import jax
import jax.numpy as jnp
from jax import lax
from jax.experimental import pallas as pl
from jax.experimental.pallas import tpu as pltpu


def _convblock_kernel(x2_ref, w_ref, p_ref, o_ref):
    wm = w_ref[...]              # (F, KC)  compute dtype (bf16 by default)
    bias = p_ref[:, 0:1]         # (F, 1) f32
    scale = p_ref[:, 1:2]        # (F, 1) f32  folded BN scale (eval mode)
    shift = p_ref[:, 2:3]        # (F, 1) f32  folded BN shift (eval mode)

    def branch(xb):              # xb: (KC, tm), lane axis = flattened spatial
        z = jnp.dot(wm, xb, preferred_element_type=jnp.float32)   # Conv2d on MXU
        z = jnp.maximum(z + bias, 0.0)                            # bias + ReLU
        return z * scale + shift                                  # BatchNorm2d (eval)

    even = branch(x2_ref[0])
    odd = branch(x2_ref[1])
    o_ref[...] = jnp.maximum(even, odd).astype(o_ref.dtype)       # MaxPool2d((2,1))


def conv_block_forward(x, weight, bias, gamma, beta, running_mean, running_var,
                       *, w, s, d, eps=1e-5, tile_m=1024,
                       compute_dtype=jnp.bfloat16):
    """ConvBlock forward (eval mode) with the hot path in a Pallas TPU kernel.

    x: (N, C, H, W) float32 (NCHW as in PyTorch)
    weight: (F, C, w, 1); bias/gamma/beta/running_*: (F,)
    returns: (N, F, H_out // 2, W) float32
    """
    N, C, H, Wd = x.shape
    F = weight.shape[0]

    # nn.ZeroPad2d((0, 0, p1, p2)) pads the H dimension by (p1, p2).
    p1 = d * (w - 1) // 2
    p2 = d * (w - 1) - p1
    x_pad = jnp.pad(x, ((0, 0), (0, 0), (p1, p2), (0, 0)))

    Hout = (H - 1) // s + 1      # conv output height (with the padding above)
    Hp = Hout // 2               # MaxPool2d((2,1)) floors
    KC = w * C
    M = N * Wd * Hp              # flattened spatial axis -> kernel lane axis

    # Transposed im2col with the even/odd h_out rows stacked on a leading axis:
    #   X2[p, k*C + c, (n, w_col, hp)] = x_pad[n, c, (2*hp + p)*s + k*d, w_col]
    taps = [x_pad[:, :, k * d:k * d + (Hout - 1) * s + 1:s, :] for k in range(w)]
    xc = jnp.stack(taps, axis=0)                 # (w, N, C, Hout, W)
    xc = xc[:, :, :, :2 * Hp, :]                 # drop trailing odd conv row
    xc = xc.reshape(w, N, C, Hp, 2, Wd)          # split h_out -> (hp, parity)
    xc = jnp.transpose(xc, (4, 0, 2, 1, 5, 3))   # (2, w, C, N, W, Hp)
    x2 = xc.reshape(2, KC, M).astype(compute_dtype)
    # TODO(synk): a fully in-kernel im2col (reading the padded NCHW input once via
    # manual DMA) would remove the remaining w-fold HBM duplication above; kept in
    # the wrapper here for robustness.

    # Conv weight flattened to (F, w*C), feature order (k, c) matching X2.
    w_flat = jnp.transpose(weight[..., 0], (0, 2, 1)).reshape(F, KC).astype(compute_dtype)

    # bias + eval-mode BatchNorm folded into one (F, 3) parameter block.
    bn_scale = gamma / jnp.sqrt(running_var + eps)
    bn_shift = beta - running_mean * bn_scale
    params = jnp.stack([bias, bn_scale, bn_shift], axis=1).astype(jnp.float32)  # (F, 3)

    # Lane-tile: multiple of 128, clamped so small problems run as one grid step.
    tile_m = max(128, (tile_m // 128) * 128)
    tm = max(128, min(tile_m, pl.cdiv(M, 128) * 128))
    M_pad = pl.cdiv(M, tm) * tm
    if M_pad != M:
        x2 = jnp.pad(x2, ((0, 0), (0, 0), (0, M_pad - M)))

    out = pl.pallas_call(
        _convblock_kernel,
        out_shape=jax.ShapeDtypeStruct((F, M_pad), jnp.float32),
        grid=(M_pad // tm,),
        in_specs=[
            pl.BlockSpec((2, KC, tm), lambda i: (0, 0, i)),   # stacked even/odd im2col
            pl.BlockSpec((F, KC), lambda i: (0, 0)),          # flattened conv weight
            pl.BlockSpec((F, 3), lambda i: (0, 0)),           # merged bias/scale/shift
        ],
        out_specs=pl.BlockSpec((F, tm), lambda i: (0, i)),    # lane-dense output
        compiler_params=pltpu.CompilerParams(
            dimension_semantics=("parallel",),
            vmem_limit_bytes=64 * 1024 * 1024),
    )(x2, w_flat, params)

    out = out[:, :M].reshape(F, N, Wd, Hp)
    out = jnp.transpose(out, (1, 0, 3, 2))   # -> (N, F, Hp, W), NCHW like PyTorch
    # TODO(synk): Dropout(0.25) is identity in eval mode; training-mode dropout and
    # batch-statistics BatchNorm (with running-stat updates) are not implemented.
    return out


def _reference(x, weight, bias, gamma, beta, rm, rv, *, w, s, d, eps=1e-5):
    """Pure-JAX reference mirroring the PyTorch forward (eval mode)."""
    p1 = d * (w - 1) // 2
    p2 = d * (w - 1) - p1
    x_pad = jnp.pad(x, ((0, 0), (0, 0), (p1, p2), (0, 0)))
    y = lax.conv_general_dilated(
        x_pad, weight, window_strides=(s, 1), padding="VALID",
        rhs_dilation=(d, 1), dimension_numbers=("NCHW", "OIHW", "NCHW"),
        precision=lax.Precision.HIGHEST)
    y = y + bias[None, :, None, None]
    y = jnp.maximum(y, 0.0)
    sc = gamma / jnp.sqrt(rv + eps)
    sh = beta - rm * sc
    y = y * sc[None, :, None, None] + sh[None, :, None, None]
    N, F, Hout, Wd = y.shape
    Hp = Hout // 2
    y = y[:, :, :2 * Hp, :].reshape(N, F, Hp, 2, Wd).max(axis=3)
    return y


if __name__ == "__main__":
    # ConvBlock(f=8, w=3, s=1, d=1, in_channels=4) on x of shape (2, 4, 16, 16).
    N, C, H, Wd = 2, 4, 16, 16
    f, w, s, d = 8, 3, 1, 1

    key = jax.random.PRNGKey(0)
    k0, k1, k2, k3, k4, k5, k6 = jax.random.split(key, 7)
    x = jax.random.normal(k0, (N, C, H, Wd), jnp.float32)
    weight = 0.1 * jax.random.normal(k1, (f, C, w, 1), jnp.float32)
    bias = 0.1 * jax.random.normal(k2, (f,), jnp.float32)
    gamma = 1.0 + 0.1 * jax.random.normal(k3, (f,), jnp.float32)
    beta = 0.1 * jax.random.normal(k4, (f,), jnp.float32)
    running_mean = 0.1 * jax.random.normal(k5, (f,), jnp.float32)
    running_var = jnp.abs(jax.random.normal(k6, (f,), jnp.float32)) + 0.5

    ref = _reference(x, weight, bias, gamma, beta, running_mean, running_var,
                     w=w, s=s, d=d)

    # Default (performance) path: bf16 operands, f32 accumulate/epilogue.
    out = conv_block_forward(x, weight, bias, gamma, beta, running_mean, running_var,
                             w=w, s=s, d=d)
    out = jax.block_until_ready(out)
    assert out.shape == ref.shape, (out.shape, ref.shape)
    max_err_bf16 = float(jnp.max(jnp.abs(out - ref)))
    assert max_err_bf16 < 2e-2, f"bf16 path mismatch vs reference: {max_err_bf16}"

    # f32 path preserves the original tight tolerance.
    out_f32 = conv_block_forward(x, weight, bias, gamma, beta, running_mean,
                                 running_var, w=w, s=s, d=d,
                                 compute_dtype=jnp.float32)
    out_f32 = jax.block_until_ready(out_f32)
    max_err_f32 = float(jnp.max(jnp.abs(out_f32 - ref)))
    assert max_err_f32 < 2e-3, f"f32 path mismatch vs reference: {max_err_f32}"

    print("KERNEL_OK")
</pallas_src>

<mosaic_0001>
module attributes {stable_mosaic.version = 11 : i64} {
  func.func @_convblock_kernel(%arg0: i32, %arg1: memref<2x12x256xbf16, #tpu.memory_space<vmem>>, %arg2: memref<8x12xbf16, #tpu.memory_space<vmem>>, %arg3: memref<8x3xf32, #tpu.memory_space<vmem>>, %arg4: memref<8x256xf32, #tpu.memory_space<vmem>>) attributes {dimension_semantics = [#tpu.dimension_semantics<parallel>], iteration_bounds = array<i64: 1>, scalar_prefetch = 0 : i64, scratch_operands = 0 : i64, tpu.core_type = #tpu.core_type<tc>, window_params = [{transform_indices = @transform_0, window_bounds = array<i64: 2, 12, 256>}, {pipeline_mode = #tpu.pipeline_mode<synchronous>, transform_indices = @transform_1, window_bounds = array<i64: 8, 12>}, {pipeline_mode = #tpu.pipeline_mode<synchronous>, transform_indices = @transform_2, window_bounds = array<i64: 8, 3>}, {transform_indices = @transform_3, window_bounds = array<i64: 8, 256>}]} {
    %c0 = arith.constant 0 : index
    %c0_0 = arith.constant 0 : index
    %0 = vector.load %arg2[%c0, %c0_0] : memref<8x12xbf16, #tpu.memory_space<vmem>>, vector<8x12xbf16>
    %c0_1 = arith.constant 0 : index
    %c0_2 = arith.constant 0 : index
    %1 = vector.load %arg3[%c0_1, %c0_2] : memref<8x3xf32, #tpu.memory_space<vmem>>, vector<8x1xf32>
    %c0_3 = arith.constant 0 : index
    %c1 = arith.constant 1 : index
    %2 = vector.load %arg3[%c0_3, %c1] : memref<8x3xf32, #tpu.memory_space<vmem>>, vector<8x1xf32>
    %c0_4 = arith.constant 0 : index
    %c2 = arith.constant 2 : index
    %3 = vector.load %arg3[%c0_4, %c2] : memref<8x3xf32, #tpu.memory_space<vmem>>, vector<8x1xf32>
    %c0_5 = arith.constant 0 : index
    %c0_6 = arith.constant 0 : index
    %c0_7 = arith.constant 0 : index
    %4 = vector.load %arg1[%c0_5, %c0_6, %c0_7] : memref<2x12x256xbf16, #tpu.memory_space<vmem>>, vector<1x12x256xbf16>
    %5 = vector.shape_cast %4 : vector<1x12x256xbf16> to vector<12x256xbf16>
    %cst = arith.constant dense<0.000000e+00> : vector<8x256xf32>
    %6 = tpu.matmul %0, %5, %cst {dimension_numbers = #tpu.dot_dimension_numbers<[1], [0], [0], [1], [0, 0, 1, 1], [], []>} : vector<8x12xbf16>, vector<12x256xbf16>, vector<8x256xf32> -> vector<8x256xf32>
    %7 = vector.broadcast %1 : vector<8x1xf32> to vector<8x256xf32>
    %8 = arith.addf %6, %7 : vector<8x256xf32>
    %cst_8 = arith.constant 0.000000e+00 : f32
    %9 = vector.broadcast %cst_8 : f32 to vector<8x256xf32>
    %10 = arith.maximumf %8, %9 : vector<8x256xf32>
    %11 = vector.broadcast %2 : vector<8x1xf32> to vector<8x256xf32>
    %12 = arith.mulf %10, %11 : vector<8x256xf32>
    %13 = vector.broadcast %3 : vector<8x1xf32> to vector<8x256xf32>
    %14 = arith.addf %12, %13 : vector<8x256xf32>
    %c1_9 = arith.constant 1 : index
    %c0_10 = arith.constant 0 : index
    %c0_11 = arith.constant 0 : index
    %15 = vector.load %arg1[%c1_9, %c0_10, %c0_11] : memref<2x12x256xbf16, #tpu.memory_space<vmem>>, vector<1x12x256xbf16>
    %16 = vector.shape_cast %15 : vector<1x12x256xbf16> to vector<12x256xbf16>
    %cst_12 = arith.constant dense<0.000000e+00> : vector<8x256xf32>
    %17 = tpu.matmul %0, %16, %cst_12 {dimension_numbers = #tpu.dot_dimension_numbers<[1], [0], [0], [1], [0, 0, 1, 1], [], []>} : vector<8x12xbf16>, vector<12x256xbf16>, vector<8x256xf32> -> vector<8x256xf32>
    %18 = vector.broadcast %1 : vector<8x1xf32> to vector<8x256xf32>
    %19 = arith.addf %17, %18 : vector<8x256xf32>
    %cst_13 = arith.constant 0.000000e+00 : f32
    %20 = vector.broadcast %cst_13 : f32 to vector<8x256xf32>
    %21 = arith.maximumf %19, %20 : vector<8x256xf32>
    %22 = vector.broadcast %2 : vector<8x1xf32> to vector<8x256xf32>
    %23 = arith.mulf %21, %22 : vector<8x256xf32>
    %24 = vector.broadcast %3 : vector<8x1xf32> to vector<8x256xf32>
    %25 = arith.addf %23, %24 : vector<8x256xf32>
    %26 = arith.maximumf %14, %25 : vector<8x256xf32>
    %c0_14 = arith.constant 0 : index
    %c0_15 = arith.constant 0 : index
    %27 = vector.load %arg4[%c0_14, %c0_15] : memref<8x256xf32, #tpu.memory_space<vmem>>, vector<8x256xf32>
    tpu.vector_store %arg4[%c0_14, %c0_15], %26 {strides = array<i32>} : memref<8x256xf32, #tpu.memory_space<vmem>>, vector<8x256xf32>,
    return
  }
  func.func @transform_0(%arg0: i32) -> (i32, i32, i32) {
    %c0_i32 = arith.constant 0 : i32
    %c0_i32_0 = arith.constant 0 : i32
    %c0_i32_1 = arith.constant 0 : i32
    return %c0_i32, %c0_i32_0, %arg0 : i32, i32, i32
  }
  func.func @transform_1(%arg0: i32) -> (i32, i32) {
    %c0_i32 = arith.constant 0 : i32
    %c0_i32_0 = arith.constant 0 : i32
    %c0_i32_1 = arith.constant 0 : i32
    return %c0_i32, %c0_i32_0 : i32, i32
  }
  func.func @transform_2(%arg0: i32) -> (i32, i32) {
    %c0_i32 = arith.constant 0 : i32
    %c0_i32_0 = arith.constant 0 : i32
    %c0_i32_1 = arith.constant 0 : i32
    return %c0_i32, %c0_i32_0 : i32, i32
  }
  func.func @transform_3(%arg0: i32) -> (i32, i32) {
    %c0_i32 = arith.constant 0 : i32
    %c0_i32_0 = arith.constant 0 : i32
    return %c0_i32, %arg0 : i32, i32
  }
}

</mosaic_0001>

<bundles_post_ra>
// kernel: tpu_custom_call.1
= control target key start
LH: loop header
LB: loop body
LE: loop exit
PB: predicated region body
PF: predicated region fallthrough
CT: control target
= control target key end

     0   :  { %vm37_vm0 = vcmask 1045504   ;;  %v227_v3 = vmov 0   ;;  %s272_s0 = inlined_call_operand.vmem [shape: bf16[2,12,256], index: 0, kind: input, shape index: {}]   ;;  %s273_s1 = inlined_call_operand.vmem [shape: bf16[8,12], index: 1, kind: input, shape index: {}]   ;;  %s274_s2 = inlined_call_operand.vmem [shape: f32[8,3], index: 2, kind: input, shape index: {}]   ;;  %s275_s3 = inlined_call_operand.hbm [shape: f32[8,256], index: 3, kind: output, shape index: {}]  }
   0x1   :  { %v199_v0 = vld [vmem:[%s272_s0 + $0x4] ss:$8 sps:$4 sm:$0x3f]   ;;  %v201_v1 = vld [vmem:[%s272_s0 + $0x14] ss:$8 sps:$4 sm:$0x3f]   ;;  %76 = vmatprep.mubr.bf16.mxu0 %v227_v3  ;;  %148 = vmatprep.mubr.bf16.mxu1 %v227_v3 }
   0x2   :  { %183 = vmatprep.subr.msk.bf16.mxu0 %vm37_vm0, %v199_v0  ;;  %v203_v2 = vld [vmem:[%s272_s0] ss:$8 sps:$4 sm:$0x3f]   ;;  %v204_v4 = vld [vmem:[%s272_s0 + $0x10] ss:$8 sps:$4 sm:$0x3f]   ;;  %195 = vset.pattern.permute.xlu0 %v227_v3 }
   0x3   :  { %v17_v5 = vld [vmem:[%s274_s2] sm:$0xff]  ;;  %189 = vmatprep.subr.msk.bf16.mxu1 %vm37_vm0, %v201_v1  ;;  %v39_v6 = vsel %vm37_vm0, %v203_v2, 0 }
   0x4   :  { %22 = vperm.xlu0 %195, %v17_v5  }
   0x5   :  { %8 = vsyncpa [#allocation3], 0  ;;  %59 = vmatpush1.bf16.msra.mxu0 %v39_v6  ;;  %v111_v7 = vsel %vm37_vm0, %v204_v4, 0  ;;  %v16_v8 = vld [vmem:[%s273_s1] sm:$0xf]  ;;  %vm33_vm1 = vcmask 97280  }
   0x6   :  { %v228_v9 = vmov 2   ;;  %131 = vmatpush1.bf16.msra.mxu1 %v111_v7  ;;  %v229_v10 = vmov 1   ;;  %s230_s0 = smov [#allocation2]  }
   0x7   :  { %197 = vset.pattern.permute.xlu1 %v228_v9  ;;  %s173_s1 = sshll.u32 %s230_s0, 4  ;;  %s174_s1 = int_to_ptr.vmem [resolvable:$true] %s173_s1 }
   0x8   :  { %94 = vperm.xlu1 %197, %v17_v5   ;;  %184 = vmatmul.mubr.msk.bf16.vlgmr.msra.gmra.mxu0 %vm33_vm1, %v16_v8  ;;  %s205_s2 = scalar_lea.vmem %s174_s1, 256  ;;  %p210_p1 = scmp.lt.s32.totalorder %s174_s1, %s174_s1 }
   0x9   :  { %196 = vset.pattern.permute.xlu0 %v229_v10  ;;  %190 = vmatmul.mubr.msk.bf16.vlgmr.msra.gmra.mxu1 %vm33_vm1, %v16_v8  ;;  %p206_p0 = scmp.ne.s32.totalorder %s174_s1, %s205_s2  ;;  %p211_p2 = scmp.lt.s32.totalorder %s205_s2, %s205_s2 }
   0xa   :  { %88 = vperm.xlu0 %196, %v17_v5  }
   0xb   :  { %p212_p3 = por %p211_p2, %p210_p1 }
   0xd   :  { %p213_p4 = pnand %p212_p3, %p206_p0 }
   0xe   :  { %198 = vset.pattern.permute.xlu0 %v228_v9 }
  0x7f   :  { %v23_v11 = vpop.permute.xlu0 %22 }
  0x83   :  { %v95_v24 = vpop.permute.xlu1 %94 }
  0x85   :  { %v89_v17 = vpop.permute.xlu0 %88 }
  0xc8   :  { %v78_v12 = vpop.f32.mrf.mxu0 }
  0xc9   :  { %v79_v13 = vadd.f32 %v78_v12, %v23_v11  ;;  %v150_v14 = vpop.f32.mrf.mxu1 }
  0xca   :  { %v151_v15 = vadd.f32 %v150_v14, %v23_v11  ;;  %v80_v16 = vpop.f32.mrf.mxu0 }
  0xcb   :  { %v85_v18 = vmax.f32 %v79_v13, 0.0  ;;  %v81_v19 = vadd.f32 %v80_v16, %v23_v11  ;;  %v152_v20 = vpop.f32.mrf.mxu1 }
  0xcc   :  { %v157_v21 = vmax.f32 %v151_v15, 0.0  ;;  %v153_v22 = vadd.f32 %v152_v20, %v23_v11  ;;  %v82_v23 = vpop.f32.mrf.mxu0 }
  0xcd   :  { %v86_v25 = vmax.f32 %v81_v19, 0.0  ;;  %v91_v26 = vmul.f32 %v89_v17, %v85_v18  ;;  %v154_v27 = vpop.f32.mrf.mxu1 }
  0xce   :  { %v158_v28 = vmax.f32 %v153_v22, 0.0  ;;  %v159_v29 = vmul.f32 %v157_v21, %v89_v17  ;;  %v83_v30 = vpop.f32.mrf.mxu0 }
  0xcf   :  { %v92_v31 = vmul.f32 %v89_v17, %v86_v25  ;;  %v97_v32 = vadd.f32 %v95_v24, %v91_v26  ;;  %v155_v33 = vpop.f32.mrf.mxu1 }
  0xd0   :  { %v160_v34 = vmul.f32 %v158_v28, %v89_v17  ;;  %v161_v35 = vadd.f32 %v159_v29, %v95_v24 }
  0xd1   :  { %v98_v36 = vadd.f32 %v95_v24, %v92_v31 }
  0xd2   :  { %v162_v37 = vadd.f32 %v160_v34, %v95_v24  ;;  %v163_v38 = vmax.f32 %v97_v32, %v161_v35 }
  0xd4   :  { %v164_v39 = vmax.f32 %v98_v36, %v162_v37  ;;  %165 = vst [vmem:[#allocation2] sm:$0xff] %v163_v38 }
  0xd6   :  { %166 = vst [vmem:[#allocation2 + $0x8] sm:$0xff] %v164_v39 }
  0xd7   :  { %216 = shalt.err (!%p213_p4)
}
  0xd8   :  { %176 = dma.vmem_to_hbm [thread:$0]  %s174_s1, 256, %s275_s3, [#allocation3]  }
  0xd9   :  { %225 = dma.done.wait [#allocation3], 256  }
  0xda   :  { %226 = vsyncadd [#allocation3], 4294967040 }
  0xdb   :  { %180 = vsyncpa [#allocation3], 1 }

</bundles_post_ra>
